<compile_context>
chip_gen: v5e
topology: v5e:2x2
jax: 0.10.0
libtpu: 0.0.40
codegen_flags: <defaults>
</compile_context>

<pallas_src>
import jax
import jax.numpy as jnp
from jax.experimental import pallas as pl
from jax.experimental.pallas import tpu as pltpu


def _pooler_kernel(x_ref, w_ref, b_ref, o_ref):
    # x_ref: [B, H_in]   first-token embeddings
    # w_ref: [H_in, tn]  column panel of the pre-transposed weight
    # b_ref: [1, tn]     bias panel
    # o_ref: [B, tn]     pooled-output panel
    y = jnp.dot(x_ref[...], w_ref[...], preferred_element_type=jnp.float32)
    y = y + b_ref[...].astype(jnp.float32)
    o_ref[...] = jnp.tanh(y).astype(o_ref.dtype)


def _tpu_hints():
    """Best-effort (physical VMEM bytes, has-two-tensorcores) detection."""
    phys_vmem = 128 * 1024 * 1024          # v5e / v6e default
    two_cores = False
    try:
        kind = (jax.devices()[0].device_kind or "").lower()
        if "v7" in kind:
            two_cores = True
            phys_vmem = 64 * 1024 * 1024   # per-TC VMEM on v7x
    except Exception:
        pass
    try:
        phys_vmem = int(pltpu.get_tpu_info().vmem_capacity_bytes)
    except Exception:
        pass
    return phys_vmem, two_cores


def _select_tn(H, itm_w):
    """Pick the output-panel width (few, big, evenly-split panels)."""
    if H % 128 != 0:
        return H                            # unaligned H: single full panel
    phys_vmem, two_cores = _tpu_hints()
    # Keep the double-buffered weight panel under ~40% of physical VMEM,
    # leaving room for activations, bias, output and compiler scratch.
    budget = phys_vmem * 2 // 5

    def fits(t):
        return 2 * t * H * itm_w <= budget

    if two_cores:
        # v7x: an even (ideally exactly 2-way) grid split keeps both
        # TensorCores streaming weights with no tail imbalance.
        half = H // 2
        if half % 128 == 0 and fits(half):
            return half
    elif fits(H):
        return H                            # single grid step on single-TC chips

    # Fallback ladder: largest 128-multiple divisor of H that fits, preferring
    # even step counts on two-core chips and multiples of 256 (MXU N-width).
    divs = [d for d in range(H, 127, -128) if H % d == 0 and fits(d)]
    if not divs:
        return 128
    if two_cores:
        even = [d for d in divs if (H // d) % 2 == 0]
        if even:
            divs = even
    d256 = [d for d in divs if d % 256 == 0]
    return (d256 or divs)[0]


def roberta_pooler(hidden_states, weight, bias, *, tn=None):
    """RobertaPooler forward.

    hidden_states: [B, S, H]
    weight:        [H, H]  (torch nn.Linear layout: [out, in])
    bias:          [H]
    """
    B, S, H = hidden_states.shape
    assert weight.shape == (H, H) and bias.shape == (H,)

    # First-token slice in the wrapper (one-time B*H copy): the activation
    # block is DMA'd once and no size-1 second-minor block is needed.
    x0 = hidden_states[:, 0, :]

    # One-time repack of the torch [out, in] weight to [in, out] so the MXU
    # contracts a plain RHS (no in-kernel transpose / staging copy).  For
    # reused inference weights, pre-transpose once outside the hot path.
    w_t = jnp.transpose(weight)
    b2d = bias.reshape(1, H)

    itm_w = weight.dtype.itemsize
    itm_x = hidden_states.dtype.itemsize
    itm_b = bias.dtype.itemsize

    if tn is None:
        tn = _select_tn(H, itm_w)
    assert H % tn == 0

    # Explicit scoped-VMEM limit sized from the actual buffers (double-
    # buffered weight/bias/output panels + resident activations + headroom),
    # capped well below physical VMEM for the detected generation.
    phys_vmem, _ = _tpu_hints()
    needed = (2 * tn * H * itm_w            # double-buffered weight panel
              + 2 * tn * itm_b              # double-buffered bias panel
              + 2 * B * H * itm_x           # activation block
              + 2 * B * tn * itm_x          # double-buffered output panel
              + (4 << 20))                  # compiler scratch headroom
    vmem_limit = int(min(max(needed, 32 << 20), phys_vmem * 3 // 4))

    cost = pl.CostEstimate(
        flops=2 * B * H * H,
        transcendentals=B * H,
        bytes_accessed=(H * H * itm_w       # weight (streamed once)
                        + H * itm_b         # bias
                        + B * H * itm_x     # activations in
                        + B * H * itm_x))   # pooled output

    return pl.pallas_call(
        _pooler_kernel,
        out_shape=jax.ShapeDtypeStruct((B, H), hidden_states.dtype),
        grid=(H // tn,),
        in_specs=[
            # Activations: same full [B, H] block for every panel.
            pl.BlockSpec((B, H), lambda j: (0, 0)),
            # j-th column panel of the pre-transposed weight [H_in, H_out].
            pl.BlockSpec((H, tn), lambda j: (0, j)),
            # j-th bias panel.
            pl.BlockSpec((1, tn), lambda j: (0, j)),
        ],
        out_specs=pl.BlockSpec((B, tn), lambda j: (0, j)),
        compiler_params=pltpu.CompilerParams(
            dimension_semantics=("parallel",),
            vmem_limit_bytes=vmem_limit),
        cost_estimate=cost,
    )(x0, w_t, b2d)


if __name__ == "__main__":
    B, S, H = 8, 8, 256
    key = jax.random.PRNGKey(0)
    k_x, k_w, k_b = jax.random.split(key, 3)

    dtype = jnp.bfloat16
    hidden_states = jax.random.normal(k_x, (B, S, H)).astype(dtype)
    bound = 1.0 / (H ** 0.5)
    weight = jax.random.uniform(k_w, (H, H), minval=-bound, maxval=bound).astype(dtype)
    bias = jax.random.uniform(k_b, (H,), minval=-bound, maxval=bound).astype(dtype)

    # Reference in plain JAX (f32 math on the same bf16-rounded values).
    x32 = hidden_states[:, 0, :].astype(jnp.float32)
    ref = jnp.tanh(x32 @ weight.astype(jnp.float32).T + bias.astype(jnp.float32))

    # 1) Auto-selected panel width (grid of 1 or 2 depending on chip gen).
    out = jax.block_until_ready(roberta_pooler(hidden_states, weight, bias))
    assert out.shape == (B, H)
    assert out.dtype == dtype
    assert jnp.allclose(out.astype(jnp.float32), ref, atol=2e-2, rtol=2e-2)

    # 2) Explicit tn=128 to exercise the multi-panel / pipelined path.
    out2 = jax.block_until_ready(roberta_pooler(hidden_states, weight, bias, tn=128))
    assert jnp.allclose(out2.astype(jnp.float32), ref, atol=2e-2, rtol=2e-2)

    print("KERNEL_OK")
</pallas_src>

<mosaic_0001>
module attributes {stable_mosaic.version = 11 : i64} {
  func.func @_pooler_kernel(%arg0: i32, %arg1: memref<8x256xbf16, #tpu.memory_space<vmem>>, %arg2: memref<256x256xbf16, #tpu.memory_space<vmem>>, %arg3: memref<1x256xbf16, #tpu.memory_space<vmem>>, %arg4: memref<8x256xbf16, #tpu.memory_space<vmem>>) attributes {dimension_semantics = [#tpu.dimension_semantics<parallel>], iteration_bounds = array<i64: 1>, scalar_prefetch = 0 : i64, scratch_operands = 0 : i64, tpu.core_type = #tpu.core_type<tc>, window_params = [{pipeline_mode = #tpu.pipeline_mode<synchronous>, transform_indices = @transform_0, window_bounds = array<i64: 8, 256>}, {transform_indices = @transform_1, window_bounds = array<i64: 256, 256>}, {transform_indices = @transform_2, window_bounds = array<i64: 1, 256>}, {transform_indices = @transform_3, window_bounds = array<i64: 8, 256>}]} {
    %c0 = arith.constant 0 : index
    %c0_0 = arith.constant 0 : index
    %0 = vector.load %arg1[%c0, %c0_0] : memref<8x256xbf16, #tpu.memory_space<vmem>>, vector<8x256xbf16>
    %c0_1 = arith.constant 0 : index
    %c0_2 = arith.constant 0 : index
    %1 = vector.load %arg2[%c0_1, %c0_2] : memref<256x256xbf16, #tpu.memory_space<vmem>>, vector<256x256xbf16>
    %cst = arith.constant dense<0.000000e+00> : vector<8x256xf32>
    %2 = tpu.matmul %0, %1, %cst {dimension_numbers = #tpu.dot_dimension_numbers<[1], [0], [0], [1], [0, 0, 1, 1], [], []>} : vector<8x256xbf16>, vector<256x256xbf16>, vector<8x256xf32> -> vector<8x256xf32>
    %c0_3 = arith.constant 0 : index
    %c0_4 = arith.constant 0 : index
    %3 = vector.load %arg3[%c0_3, %c0_4] : memref<1x256xbf16, #tpu.memory_space<vmem>>, vector<1x256xbf16>
    %4 = arith.extf %3 : vector<1x256xbf16> to vector<1x256xf32>
    %5 = vector.broadcast %4 : vector<1x256xf32> to vector<8x256xf32>
    %6 = arith.addf %2, %5 : vector<8x256xf32>
    %7 = math.tanh %6 : vector<8x256xf32>
    %8 = arith.truncf %7 : vector<8x256xf32> to vector<8x256xbf16>
    %c0_5 = arith.constant 0 : index
    %c0_6 = arith.constant 0 : index
    %9 = vector.load %arg4[%c0_5, %c0_6] : memref<8x256xbf16, #tpu.memory_space<vmem>>, vector<8x256xbf16>
    tpu.vector_store %arg4[%c0_5, %c0_6], %8 {strides = array<i32>} : memref<8x256xbf16, #tpu.memory_space<vmem>>, vector<8x256xbf16>,
    return
  }
  func.func @transform_0(%arg0: i32) -> (i32, i32) {
    %c0_i32 = arith.constant 0 : i32
    %c0_i32_0 = arith.constant 0 : i32
    %c0_i32_1 = arith.constant 0 : i32
    return %c0_i32, %c0_i32_0 : i32, i32
  }
  func.func @transform_1(%arg0: i32) -> (i32, i32) {
    %c0_i32 = arith.constant 0 : i32
    %c0_i32_0 = arith.constant 0 : i32
    return %c0_i32, %arg0 : i32, i32
  }
  func.func @transform_2(%arg0: i32) -> (i32, i32) {
    %c0_i32 = arith.constant 0 : i32
    %c0_i32_0 = arith.constant 0 : i32
    return %c0_i32, %arg0 : i32, i32
  }
  func.func @transform_3(%arg0: i32) -> (i32, i32) {
    %c0_i32 = arith.constant 0 : i32
    %c0_i32_0 = arith.constant 0 : i32
    return %c0_i32, %arg0 : i32, i32
  }
}

</mosaic_0001>

<bundles_post_ra>
// kernel: tpu_custom_call.1
= control target key start
LH: loop header
LB: loop body
LE: loop exit
PB: predicated region body
PF: predicated region fallthrough
CT: control target
= control target key end

     0   :  { %8 = vsyncpa [#allocation3], 0  ;;  %s651_s0 = inlined_call_operand.hbm [shape: bf16[8,256], index: 0, kind: input, shape index: {}]   ;;  %s652_s1 = inlined_call_operand.hbm [shape: bf16[256,256], index: 1, kind: input, shape index: {}]   ;;  %s653_s2 = inlined_call_operand.hbm [shape: bf16[1,256], index: 2, kind: input, shape index: {}]   ;;  %s654_s3 = inlined_call_operand.hbm [shape: bf16[8,256], index: 3, kind: output, shape index: {}]  }
   0x1   :  { %9 = vsyncpa [#allocation6], 0  ;;  %s26_s14 = sshll.u32 %s652_s1, 4  ;;  %s27_s14 = int_to_ptr.hbm [resolvable:$true] %s26_s14 }
   0x2   :  { %10 = vsyncpa [#allocation4], 0  ;;  %s613_s15 = smov [#allocation5]   ;;  %s16_s19 = sshll.u32 %s651_s0, 4  ;;  %s17_s19 = int_to_ptr.hbm [resolvable:$true] %s16_s19 }
   0x3   :  { %s28_s16 = sshll.u32 %s613_s15, 4  ;;  %s614_s20 = smov 128   ;;  %s29_s16 = int_to_ptr.vmem [resolvable:$true] %s28_s16 }
   0x4   :  { %s615_s21 = smov 8   ;;  %s616_s22 = smov [#allocation2]  }
   0x5   :  { %34 = dma.hbm_to_vmem [thread:$0]  %s27_s14, 4096, %s29_s16, [#allocation6], %s614_s20, %s614_s20, %s615_s21  }
   0x6   :  { %s18_s23 = sshll.u32 %s616_s22, 4  ;;  %s40_s26 = sshll.u32 %s653_s2, 4  ;;  %s19_s23 = int_to_ptr.vmem [resolvable:$true] %s18_s23  ;;  %s41_s26 = int_to_ptr.hbm [resolvable:$true] %s40_s26 }
   0x7   :  { %21 = dma.hbm_to_vmem [thread:$0]  %s17_s19, 128, %s19_s23, [#allocation3]  }
   0x8   :  { %s617_s1 = smov [#allocation7]  }
   0x9   :  { %s42_s27 = sshll.u32 %s617_s1, 4  ;;  %s43_s27 = int_to_ptr.vmem [resolvable:$true] %s42_s27 }
   0xa   :  { %45 = dma.hbm_to_vmem [thread:$0]  %s41_s26, 32, %s43_s27, [#allocation6]  }
   0xb   :  { %607 = dma.done.wait [#allocation3], 128  }
   0xc   :  { %608 = vsyncadd [#allocation3], 4294967168 }
   0xd   :  { %609 = dma.done.wait [#allocation6], 4128  }
   0xe   :  { %610 = vsyncadd [#allocation6], 4294963168  ;;  %v399_v0 = vld [vmem:[#allocation5 + $0x70] sm:$0xf]  ;;  %v484_v1 = vld [vmem:[#allocation5 + $0x74] sm:$0xf0] }
   0xf   :  { %v463_v2 = vld [vmem:[#allocation5 + $0xf0] sm:$0xf]  ;;  %v400_v3 = vor.u32 %v484_v1, %v399_v0  ;;  %v500_v4 = vld [vmem:[#allocation5 + $0xf4] sm:$0xf0]  ;;  %v483_v5 = vld [vmem:[#allocation5 + $0x74] sm:$0xf] }
  0x10   :  { %v401_v6 = vld [vmem:[#allocation5 + $0x78] sm:$0xf0]  ;;  %v464_v7 = vor.u32 %v500_v4, %v463_v2  ;;  %v499_v9 = vld [vmem:[#allocation5 + $0xf4] sm:$0xf]  ;;  %v391_v11 = vld [vmem:[#allocation5 + $0x60] sm:$0xf] }
  0x11   :  { %v404_v8 = vor.u32 %v483_v5, %v401_v6  ;;  %v465_v10 = vld [vmem:[#allocation5 + $0xf8] sm:$0xf0]  ;;  %267 = vmatpush.bf16.msra.mxu0 %v400_v3  ;;  %v482_v13 = vld [vmem:[#allocation5 + $0x64] sm:$0xf0]  ;;  %v455_v14 = vld [vmem:[#allocation5 + $0xe0] sm:$0xf] }
  0x12   :  { %v468_v12 = vor.u32 %v499_v9, %v465_v10  ;;  %v498_v15 = vld [vmem:[#allocation5 + $0xe4] sm:$0xf0]  ;;  %280 = vmatpush.bf16.msra.mxu1 %v464_v7  ;;  %v392_v16 = vor.u32 %v482_v13, %v391_v11  ;;  %v481_v18 = vld [vmem:[#allocation5 + $0x64] sm:$0xf]  ;;  %v393_v19 = vld [vmem:[#allocation5 + $0x68] sm:$0xf0] }
  0x13   :  { %293 = vmatpush.bf16.msra.mxu2 %v404_v8  ;;  %v456_v17 = vor.u32 %v498_v15, %v455_v14  ;;  %v497_v20 = vld [vmem:[#allocation5 + $0xe4] sm:$0xf]  ;;  %v396_v21 = vor.u32 %v481_v18, %v393_v19  ;;  %v457_v22 = vld [vmem:[#allocation5 + $0xe8] sm:$0xf0]  ;;  %v383_v23 = vld [vmem:[#allocation5 + $0x50] sm:$0xf] }
  0x14   :  { %306 = vmatpush.bf16.msra.mxu3 %v468_v12  ;;  %v480_v24 = vld [vmem:[#allocation5 + $0x54] sm:$0xf0]  ;;  %v460_v25 = vor.u32 %v497_v20, %v457_v22  ;;  %v447_v26 = vld [vmem:[#allocation5 + $0xd0] sm:$0xf]  ;;  %v479_v28 = vld [vmem:[#allocation5 + $0x54] sm:$0xf] }
  0x15   :  { %v496_v27 = vld [vmem:[#allocation5 + $0xd4] sm:$0xf0]  ;;  %268 = vmatpush.bf16.msra.mxu0 %v392_v16  ;;  %v384_v29 = vor.u32 %v480_v24, %v383_v23  ;;  %v385_v30 = vld [vmem:[#allocation5 + $0x58] sm:$0xf0]  ;;  %v495_v31 = vld [vmem:[#allocation5 + $0xd4] sm:$0xf] }
  0x16   :  { %v449_v32 = vld [vmem:[#allocation5 + $0xd8] sm:$0xf0]  ;;  %281 = vmatpush.bf16.msra.mxu1 %v456_v17  ;;  %v448_v33 = vor.u32 %v496_v27, %v447_v26  ;;  %v388_v34 = vor.u32 %v479_v28, %v385_v30  ;;  %v375_v35 = vld [vmem:[#allocation5 + $0x40] sm:$0xf]  ;;  %v478_v36 = vld [vmem:[#allocation5 + $0x44] sm:$0xf0] }
  0x17   :  { %294 = vmatpush.bf16.msra.mxu2 %v396_v21  ;;  %v439_v37 = vld [vmem:[#allocation5 + $0xc0] sm:$0xf]  ;;  %v452_v38 = vor.u32 %v495_v31, %v449_v32  ;;  %v494_v39 = vld [vmem:[#allocation5 + $0xc4] sm:$0xf0]  ;;  %v477_v40 = vld [vmem:[#allocation5 + $0x44] sm:$0xf]  ;;  %v376_v44 = vor.u32 %v478_v36, %v375_v35 }
  0x18   :  { %307 = vmatpush.bf16.msra.mxu3 %v460_v25  ;;  %v377_v41 = vld [vmem:[#allocation5 + $0x48] sm:$0xf0]  ;;  %v493_v42 = vld [vmem:[#allocation5 + $0xc4] sm:$0xf]  ;;  %v440_v45 = vor.u32 %v494_v39, %v439_v37  ;;  %v367_v47 = vld [vmem:[#allocation5 + $0x30] sm:$0xf] }
  0x19   :  { %v441_v43 = vld [vmem:[#allocation5 + $0xc8] sm:$0xf0]  ;;  %269 = vmatpush.bf16.msra.mxu0 %v384_v29  ;;  %v380_v46 = vor.u32 %v477_v40, %v377_v41  ;;  %v476_v48 = vld [vmem:[#allocation5 + $0x34] sm:$0xf0]  ;;  %v431_v49 = vld [vmem:[#allocation5 + $0xb0] sm:$0xf] }
  0x1a   :  { %282 = vmatpush.bf16.msra.mxu1 %v448_v33  ;;  %v444_v50 = vor.u32 %v493_v42, %v441_v43  ;;  %v492_v51 = vld [vmem:[#allocation5 + $0xb4] sm:$0xf0]  ;;  %v475_v52 = vld [vmem:[#allocation5 + $0x34] sm:$0xf]  ;;  %v369_v53 = vld [vmem:[#allocation5 + $0x38] sm:$0xf0]  ;;  %v368_v56 = vor.u32 %v476_v48, %v367_v47 }
  0x1b   :  { %295 = vmatpush.bf16.msra.mxu2 %v388_v34  ;;  %v491_v54 = vld [vmem:[#allocation5 + $0xb4] sm:$0xf]  ;;  %v433_v55 = vld [vmem:[#allocation5 + $0xb8] sm:$0xf0]  ;;  %v432_v57 = vor.u32 %v492_v51, %v431_v49  ;;  %v372_v58 = vor.u32 %v475_v52, %v369_v53  ;;  %v359_v59 = vld [vmem:[#allocation5 + $0x20] sm:$0xf] }
  0x1c   :  { %308 = vmatpush.bf16.msra.mxu3 %v452_v38  ;;  %v474_v60 = vld [vmem:[#allocation5 + $0x24] sm:$0xf0]  ;;  %v423_v61 = vld [vmem:[#allocation5 + $0xa0] sm:$0xf]  ;;  %v436_v62 = vor.u32 %v491_v54, %v433_v55  ;;  %v473_v0 = vld [vmem:[#allocation5 + $0x24] sm:$0xf] }
  0x1d   :  { %270 = vmatpush.bf16.msra.mxu0 %v376_v44  ;;  %v490_v63 = vld [vmem:[#allocation5 + $0xa4] sm:$0xf0]  ;;  %v361_v1 = vld [vmem:[#allocation5 + $0x28] sm:$0xf0]  ;;  %v489_v2 = vld [vmem:[#allocation5 + $0xa4] sm:$0xf]  ;;  %v360_v4 = vor.u32 %v474_v60, %v359_v59 }
  0x1e   :  { %283 = vmatpush.bf16.msra.mxu1 %v440_v45  ;;  %v425_v3 = vld [vmem:[#allocation5 + $0xa8] sm:$0xf0]  ;;  %v424_v5 = vor.u32 %v490_v63, %v423_v61  ;;  %v364_v6 = vor.u32 %v473_v0, %v361_v1  ;;  %v351_v7 = vld [vmem:[#allocation5 + $0x10] sm:$0xf]  ;;  %v472_v8 = vld [vmem:[#allocation5 + $0x14] sm:$0xf0] }
  0x1f   :  { %296 = vmatpush.bf16.msra.mxu2 %v380_v46  ;;  %v415_v9 = vld [vmem:[#allocation5 + $0x90] sm:$0xf]  ;;  %v428_v10 = vor.u32 %v489_v2, %v425_v3  ;;  %v488_v11 = vld [vmem:[#allocation5 + $0x94] sm:$0xf0]  ;;  %v471_v12 = vld [vmem:[#allocation5 + $0x14] sm:$0xf]  ;;  %v352_v16 = vor.u32 %v472_v8, %v351_v7 }
  0x20   :  { %309 = vmatpush.bf16.msra.mxu3 %v444_v50  ;;  %v353_v13 = vld [vmem:[#allocation5 + $0x18] sm:$0xf0]  ;;  %v487_v14 = vld [vmem:[#allocation5 + $0x94] sm:$0xf]  ;;  %v416_v18 = vor.u32 %v488_v11, %v415_v9  ;;  %v343_v20 = vld [vmem:[#allocation5] sm:$0xf] }
  0x21   :  { %271 = vmatpush.bf16.msra.mxu0 %v368_v56  ;;  %v417_v15 = vld [vmem:[#allocation5 + $0x98] sm:$0xf0]  ;;  %v356_v19 = vor.u32 %v471_v12, %v353_v13  ;;  %v470_v21 = vld [vmem:[#allocation5 + $0x4] sm:$0xf0]  ;;  %v407_v22 = vld [vmem:[#allocation5 + $0x80] sm:$0xf] }
  0x22   :  { %284 = vmatpush.bf16.msra.mxu1 %v432_v57  ;;  %v58_v17 = vld [vmem:[#allocation2] sm:$0xff]  ;;  %v420_v23 = vor.u32 %v487_v14, %v417_v15  ;;  %v486_v24 = vld [vmem:[#allocation5 + $0x84] sm:$0xf0]  ;;  %v469_v25 = vld [vmem:[#allocation5 + $0x4] sm:$0xf]  ;;  %v344_v30 = vor.u32 %v470_v21, %v343_v20  ;;  %s618_s0 = smov [#allocation8]  }
  0x23   :  { %297 = vmatpush.bf16.msra.mxu2 %v372_v58  ;;  %v345_v26 = vld [vmem:[#allocation5 + $0x8] sm:$0xf0]  ;;  %v485_v27 = vld [vmem:[#allocation5 + $0x84] sm:$0xf]  ;;  %v101_v29 = vunpack.c.l.b16 %v58_v17  ;;  %v102_v31 = vunpack.c.h.b16 %v58_v17  ;;  %v408_v32 = vor.u32 %v486_v24, %v407_v22  ;;  %v91_v37 = vld [vmem:[#allocation7] sm:$0x3] }
  0x24   :  { %310 = vmatpush.bf16.msra.mxu3 %v436_v62  ;;  %v409_v28 = vld [vmem:[#allocation5 + $0x88] sm:$0xf0]  ;;  %v348_v33 = vor.u32 %v469_v25, %v345_v26  ;;  %v92_v38 = vunpack.c.l.bf16 %v91_v37  ;;  %s328_s2 = sshll.u32 %s618_s0, 4  ;;  %s330_s30 = sshll.u32 %s654_s3, 4  ;;  %s329_s2 = int_to_ptr.vmem [resolvable:$true] %s328_s2  ;;  %s331_s30 = int_to_ptr.hbm [resolvable:$true] %s330_s30 }
  0x25   :  { %272 = vmatpush.bf16.msra.mxu0 %v360_v4  ;;  %v412_v34 = vor.u32 %v485_v27, %v409_v28  ;;  %v103_v35 = vpack.c.b16 %v101_v29, %v101_v29  ;;  %v104_v36 = vpack.c.b16 %v102_v31, %v102_v31 }
  0x26   :  { %285 = vmatpush.bf16.msra.mxu1 %v424_v5  ;;  %v94_v39 = vperm.slane %v92_v38, 0  ;;  %v95_v42 = vperm.slane %v92_v38, 2 }
  0x27   :  { %298 = vmatpush.bf16.msra.mxu2 %v364_v6 }
  0x28   :  { %311 = vmatpush.bf16.msra.mxu3 %v428_v10  ;;  %v98_v40 = vperm.slane %v94_v39, 0  ;;  %v99_v45 = vperm.slane %v95_v42, 0 }
  0x29   :  { %273 = vmatpush.bf16.msra.mxu0 %v352_v16 }
  0x2a   :  { %286 = vmatpush.bf16.msra.mxu1 %v416_v18 }
  0x2b   :  { %299 = vmatpush.bf16.msra.mxu2 %v356_v19 }
  0x2c   :  { %312 = vmatpush.bf16.msra.mxu3 %v420_v23 }
  0x2d   :  { %274 = vmatpush.bf16.msra.mxu0 %v344_v30 }
  0x2e   :  { %287 = vmatpush.bf16.msra.mxu1 %v408_v32 }
  0x2f   :  { %300 = vmatpush.bf16.msra.mxu2 %v348_v33 }
  0x30   :  { %313 = vmatpush.bf16.msra.mxu3 %v412_v34  ;;  %275 = vmatmul.bf16.vlgmr.msra.gmra.mxu0 %v103_v35 }
  0x31   :  { %288 = vmatmul.bf16.vlgmr.msra.gmra.mxu1 %v104_v36 }
  0x32   :  { %301 = vmatmul.bf16.vlgmr.msra.gmra.mxu2 %v103_v35 }
  0x33   :  { %314 = vmatmul.bf16.vlgmr.msra.gmra.mxu3 %v104_v36 }
  0xad   :  { %v276_v41 = vpop.f32.mrf.mxu0 }
  0xae   :  { %v289_v43 = vpop.f32.mrf.mxu1  ;;  %v277_v44 = vadd.f32 %v276_v41, %v98_v40 }
  0xb0   :  { %v290_v46 = vadd.f32 %v289_v43, %v277_v44 }
  0xb2   :  { %507 = vtanh.f32 %v290_v46 }
  0xb5   :  { %v302_v47 = vpop.f32.mrf.mxu2  ;;  %v278_v50 = vpop.f32.mrf.mxu0 }
  0xb6   :  { %v303_v48 = vadd.f32 %v302_v47, %v99_v45  ;;  %v315_v49 = vpop.f32.mrf.mxu3  ;;  %v291_v51 = vpop.f32.mrf.mxu1 }
  0xb8   :  { %v316_v52 = vadd.f32 %v315_v49, %v303_v48  ;;  %v508_v54 = vpop.eup %507 }
  0xba   :  { %509 = vtanh.f32 %v316_v52 }
  0xbd   :  { %v304_v53 = vpop.f32.mrf.mxu2 }
  0xbe   :  { %v317_v55 = vpop.f32.mrf.mxu3 }
  0xc0   :  { %v510_v56 = vpop.eup %509 }
  0xc1   :  { %v321_v57 = vpack.c.bf16 %v510_v56, %v508_v54 }
  0xc3   :  { %322 = vst [vmem:[#allocation8] sm:$0xff] %v321_v57 }
  0xc4   :  { %333 = dma.vmem_to_hbm [thread:$0]  %s329_s2, 128, %s331_s30, [#allocation4]  }
  0xc5   :  { %611 = dma.done.wait [#allocation4], 128  }
  0xc6   :  { %612 = vsyncadd [#allocation4], 4294967168 }
  0xc7   :  { %338 = vsyncpa [#allocation3], 1 }
  0xc8   :  { %339 = vsyncpa [#allocation6], 1 }
  0xc9   :  { %340 = vsyncpa [#allocation4], 1 }

</bundles_post_ra>
